<compile_context>
chip_gen: v7x
topology: tpu7x:2x2x1
jax: 0.10.0
libtpu: 0.0.40
codegen_flags: <defaults>
</compile_context>

<pallas_src>
import jax
import jax.numpy as jnp
from jax.experimental import pallas as pl
from jax.experimental.pallas import tpu as pltpu

_OUT_PAD = 128  # lane-dense padded width for the (B, 1) output head
_HIGHEST = jax.lax.Precision.HIGHEST


# ----------------------------------------------------------------------------
# Fused kernel
# ----------------------------------------------------------------------------
def _make_fused_mlp_kernel(n_hidden, has_output):
    """Fused kernel: n_hidden (folded Linear+BN+ReLU) layers + optional padded
    Linear(., 128) head.
    Ref order: x, (w_i, b_i) * n_hidden, [w_out_pad, b_out_pad], out.
    Weights already arrive in the MXU compute dtype (bf16 or f32); biases f32."""

    def kernel(*refs):
        o_ref = refs[-1]
        idx = 0
        h = refs[idx][...]                      # (tm, d_in); stays f32 between layers
        idx += 1
        for _ in range(n_hidden):
            w = refs[idx][...]                  # (K, N) in compute dtype (bf16/f32)
            b = refs[idx + 1][...]              # (1, N) f32, broadcasts over batch
            idx += 2
            acc = jnp.dot(h.astype(w.dtype), w, preferred_element_type=jnp.float32)
            # BN already folded into (w, b); Dropout is identity in eval mode.
            h = jnp.maximum(acc + b, 0.0)
        if has_output:
            w = refs[idx][...]                  # (D_last, 128): column 0 real, rest zero
            b = refs[idx + 1][...]              # (1, 128) f32 padded bias
            acc = jnp.dot(h.astype(w.dtype), w, preferred_element_type=jnp.float32)
            o_ref[...] = (acc + b).astype(o_ref.dtype)   # lane-dense store, no vst.msk
        else:
            o_ref[...] = h.astype(o_ref.dtype)

    return kernel


# ----------------------------------------------------------------------------
# One-time parameter preprocessing (host/XLA side, outside the kernel)
# ----------------------------------------------------------------------------
def prepare_mlp(params, *, use_bf16=True):
    """Flatten + preprocess params ONCE:
      * BN was folded into each Linear at init time (see init_mlp_params).
      * Weights are cast to bf16 here (when use_bf16) so they live in HBM as
        bf16 -> half the DMA bytes/VMEM; the kernel never casts a weight.
      * The (D_last, 1) output head is zero-padded to (D_last, 128) so the head
        becomes a plain lane-dense MXU dot."""
    compute_dtype = jnp.bfloat16 if use_bf16 else jnp.float32
    hidden = [p for p in params if p["kind"] == "hidden"]
    out_layer = next((p for p in params if p["kind"] == "output"), None)

    arrays = []
    hidden_widths = []
    for p in hidden:
        arrays.append(p["w"].astype(compute_dtype))
        arrays.append(p["b"].reshape(1, -1).astype(jnp.float32))
        hidden_widths.append(p["w"].shape[1])
    if out_layer is not None:
        d_last = out_layer["w"].shape[0]
        w_pad = jnp.zeros((d_last, _OUT_PAD), compute_dtype)
        w_pad = w_pad.at[:, 0].set(out_layer["w"][:, 0].astype(compute_dtype))
        b_pad = jnp.zeros((1, _OUT_PAD), jnp.float32)
        b_pad = b_pad.at[0, 0].set(out_layer["b"][0].astype(jnp.float32))
        arrays += [w_pad, b_pad]

    return dict(arrays=[jax.device_put(a) for a in arrays],
                n_hidden=len(hidden),
                has_output=out_layer is not None,
                hidden_widths=hidden_widths,
                compute_dtype=compute_dtype)


# ----------------------------------------------------------------------------
# Wrapper: single pallas_call for the full MLP
# ----------------------------------------------------------------------------
def _pick_batch_tile(B, block_batch):
    """Largest-but-split batch tile: >= 2 grid steps when B > 8 so the
    'parallel' batch axis can shard across v7x's two TensorCores."""
    if B > block_batch:
        return block_batch
    if B <= 8:
        return B
    return min(B, 8 * pl.cdiv(pl.cdiv(B, 2), 8))


def _vmem_limit_bytes(x, arrays, tm, d_in, out_width, out_itemsize,
                      act_width, single_buffer_weights):
    """Explicit scoped-VMEM budget: params x buffer count + pipelined x/out
    tiles + f32 activation temporaries, with headroom."""
    wbuf = 1 if single_buffer_weights else 2
    est = 2 * tm * d_in * x.dtype.itemsize                          # input tiles (2-buffered)
    est += sum(wbuf * a.size * a.dtype.itemsize for a in arrays)    # pinned params
    est += 2 * tm * out_width * out_itemsize                        # output tiles (2-buffered)
    est += 4 * tm * act_width * 4                                   # f32 activation temps
    est = int(est * 1.5) + (1 << 20)
    # Never tighter than the largest default scoped limit (32 MiB), never above
    # v7x's 64 MiB physical VMEM.
    return max(min(est, 64 << 20), 32 << 20)


def mlp_forward(prepared, x, *, block_batch=512):
    """Fused eval-mode forward pass: one pallas_call for the whole MLP."""
    B, d_in = x.shape
    arrays = prepared["arrays"]
    n_hidden = prepared["n_hidden"]
    has_output = prepared["has_output"]
    hidden_widths = prepared["hidden_widths"]

    tm = _pick_batch_tile(B, block_batch)
    grid = (pl.cdiv(B, tm),)

    if has_output:
        out_width = _OUT_PAD
    else:
        out_width = hidden_widths[-1] if hidden_widths else d_in
    out_shape = jax.ShapeDtypeStruct((B, out_width), x.dtype)
    out_spec = pl.BlockSpec((tm, out_width), lambda i: (i, 0))

    act_width = max([d_in] + hidden_widths + ([_OUT_PAD] if has_output else []))
    kernel = _make_fused_mlp_kernel(n_hidden, has_output)

    def run(single_buffer_weights):
        in_specs = [pl.BlockSpec((tm, d_in), lambda i: (i, 0))]
        for a in arrays:
            # Weights/biases pinned VMEM-resident (constant block index):
            # single-buffer them -> no point double-buffering constants.
            if single_buffer_weights:
                spec = pl.BlockSpec(a.shape, lambda i: (0, 0),
                                    pipeline_mode=pl.Buffered(1))
            else:
                spec = pl.BlockSpec(a.shape, lambda i: (0, 0))
            in_specs.append(spec)
        vmem_limit = _vmem_limit_bytes(x, arrays, tm, d_in, out_width,
                                       x.dtype.itemsize, act_width,
                                       single_buffer_weights)
        return pl.pallas_call(
            kernel,
            out_shape=out_shape,
            grid=grid,
            in_specs=in_specs,
            out_specs=out_spec,
            compiler_params=pltpu.CompilerParams(
                # batch tiles are independent -> megacore-shardable on v7x
                dimension_semantics=("parallel",),
                vmem_limit_bytes=vmem_limit),
        )(x, *arrays)

    try:
        out = run(single_buffer_weights=True)
    except Exception:
        # Fallback for jax versions where pipeline_mode / pl.Buffered(1) is not
        # supported on TPU pallas_call BlockSpecs (functionally identical; the
        # pinned weights are just double-buffered).
        out = run(single_buffer_weights=False)

    if has_output:
        out = out[:, :1]
    return out


# ----------------------------------------------------------------------------
# Parameter construction (BN folded into the Linear) + pure-JAX references
# ----------------------------------------------------------------------------
def init_mlp_params(key, input_dim, embed_dims, output_layer=True,
                    dtype=jnp.float32):
    """Deterministic synthetic init mirroring the torch module's shapes.
    Eval-mode BatchNorm1d is folded completely into each Linear:
        y = (x@W + b - mean)/sqrt(var+eps)*gamma + beta
          = x @ (W*scale) + (b*scale + shift)."""
    params = []
    in_dim = input_dim
    eps = 1e-5
    for embed_dim in embed_dims:
        key, kw, kb, kg, kbt, km, kv = jax.random.split(key, 7)
        bound = float(in_dim) ** -0.5
        w = jax.random.uniform(kw, (in_dim, embed_dim), dtype,
                               minval=-bound, maxval=bound)   # == torch weight.T
        b = jax.random.uniform(kb, (embed_dim,), dtype,
                               minval=-bound, maxval=bound)
        gamma = 1.0 + 0.1 * jax.random.normal(kg, (embed_dim,), dtype)
        beta = 0.1 * jax.random.normal(kbt, (embed_dim,), dtype)
        run_mean = 0.1 * jax.random.normal(km, (embed_dim,), dtype)
        run_var = jnp.abs(1.0 + 0.1 * jax.random.normal(kv, (embed_dim,), dtype))
        scale = gamma / jnp.sqrt(run_var + eps)
        shift = beta - run_mean * scale
        params.append(dict(
            kind="hidden",
            w=w * scale[None, :],          # folded weight (f32)
            b=b * scale + shift,           # folded bias (f32)
            raw=dict(w=w, b=b, gamma=gamma, beta=beta,
                     mean=run_mean, var=run_var, eps=eps),
        ))
        in_dim = embed_dim
    if output_layer:
        key, kw, kb = jax.random.split(key, 3)
        bound = float(in_dim) ** -0.5
        w = jax.random.uniform(kw, (in_dim, 1), dtype, minval=-bound, maxval=bound)
        b = jax.random.uniform(kb, (1,), dtype, minval=-bound, maxval=bound)
        params.append(dict(kind="output", w=w, b=b))
    return params


def mlp_reference(params, x):
    """Pure-JAX reference using the ORIGINAL (unfolded) Linear + BN + ReLU math."""
    for layer in params:
        if layer["kind"] == "hidden":
            r = layer["raw"]
            h = jnp.dot(x, r["w"], precision=_HIGHEST) + r["b"]
            h = (h - r["mean"]) * (r["gamma"] / jnp.sqrt(r["var"] + r["eps"])) + r["beta"]
            x = jnp.maximum(h, 0.0)
        else:
            x = jnp.dot(x, layer["w"], precision=_HIGHEST) + layer["b"]
    return x


def mlp_reference_folded(params, x, compute_dtype=jnp.float32):
    """Emulates the kernel's exact math in plain JAX: BN-folded weights quantized
    to compute_dtype, activations quantized at each matmul input, f32 accumulate."""
    h = x
    for layer in params:
        w = layer["w"].astype(compute_dtype).astype(jnp.float32)
        hq = h.astype(compute_dtype).astype(jnp.float32)
        acc = jnp.dot(hq, w, precision=_HIGHEST)
        if layer["kind"] == "hidden":
            h = jnp.maximum(acc + layer["b"], 0.0)
        else:
            h = acc + layer["b"]
    return h


# ----------------------------------------------------------------------------
if __name__ == "__main__":
    key = jax.random.PRNGKey(0)
    kx, kp = jax.random.split(key)

    batch = 32
    input_dim = 16
    embed_dims = (64, 32)
    dropout = 0.2          # eval-mode Dropout = identity

    x = jax.random.normal(kx, (batch, input_dim), jnp.float32)
    params = init_mlp_params(kp, input_dim, embed_dims, output_layer=True)

    # --- f32 weight path: exact check vs. the unfolded Linear+BN+ReLU math ---
    prep_f32 = prepare_mlp(params, use_bf16=False)
    out_f32 = jax.block_until_ready(mlp_forward(prep_f32, x))
    ref = mlp_reference(params, x)
    assert out_f32.shape == (batch, 1), out_f32.shape
    assert jnp.allclose(out_f32, ref, atol=1e-4, rtol=1e-4)

    # --- bf16 weight path (default): check vs. a bf16-quantized reference ---
    prep_bf16 = prepare_mlp(params)                      # use_bf16=True default
    out_bf16 = jax.block_until_ready(mlp_forward(prep_bf16, x))
    ref_bf16 = mlp_reference_folded(params, x, jnp.bfloat16)
    assert out_bf16.shape == (batch, 1), out_bf16.shape
    assert jnp.allclose(out_bf16, ref_bf16, atol=1e-2, rtol=1e-2)
    assert jnp.allclose(out_bf16, ref, atol=1e-1, rtol=1e-1)   # sanity vs exact math

    print("KERNEL_OK")
</pallas_src>

<mosaic_0001>
module attributes {stable_mosaic.version = 11 : i64} {
  func.func @kernel(%arg0: i32, %arg1: memref<16x16xf32, #tpu.memory_space<vmem>>, %arg2: memref<16x64xf32, #tpu.memory_space<vmem>>, %arg3: memref<1x64xf32, #tpu.memory_space<vmem>>, %arg4: memref<64x32xf32, #tpu.memory_space<vmem>>, %arg5: memref<1x32xf32, #tpu.memory_space<vmem>>, %arg6: memref<32x128xf32, #tpu.memory_space<vmem>>, %arg7: memref<1x128xf32, #tpu.memory_space<vmem>>, %arg8: memref<16x128xf32, #tpu.memory_space<vmem>>) attributes {dimension_semantics = [#tpu.dimension_semantics<parallel>], iteration_bounds = array<i64: 2>, scalar_prefetch = 0 : i64, scratch_operands = 0 : i64, tpu.core_type = #tpu.core_type<tc>, window_params = [{transform_indices = @transform_0, window_bounds = array<i64: 16, 16>}, {pipeline_mode = #tpu.pipeline_mode<synchronous>, transform_indices = @transform_1, window_bounds = array<i64: 16, 64>}, {pipeline_mode = #tpu.pipeline_mode<synchronous>, transform_indices = @transform_2, window_bounds = array<i64: 1, 64>}, {pipeline_mode = #tpu.pipeline_mode<synchronous>, transform_indices = @transform_3, window_bounds = array<i64: 64, 32>}, {pipeline_mode = #tpu.pipeline_mode<synchronous>, transform_indices = @transform_4, window_bounds = array<i64: 1, 32>}, {pipeline_mode = #tpu.pipeline_mode<synchronous>, transform_indices = @transform_5, window_bounds = array<i64: 32, 128>}, {pipeline_mode = #tpu.pipeline_mode<synchronous>, transform_indices = @transform_6, window_bounds = array<i64: 1, 128>}, {transform_indices = @transform_7, window_bounds = array<i64: 16, 128>}]} {
    %c0 = arith.constant 0 : index
    %c0_0 = arith.constant 0 : index
    %0 = vector.load %arg1[%c0, %c0_0] : memref<16x16xf32, #tpu.memory_space<vmem>>, vector<16x16xf32>
    %c0_1 = arith.constant 0 : index
    %c0_2 = arith.constant 0 : index
    %1 = vector.load %arg2[%c0_1, %c0_2] : memref<16x64xf32, #tpu.memory_space<vmem>>, vector<16x64xf32>
    %c0_3 = arith.constant 0 : index
    %c0_4 = arith.constant 0 : index
    %2 = vector.load %arg3[%c0_3, %c0_4] : memref<1x64xf32, #tpu.memory_space<vmem>>, vector<1x64xf32>
    %cst = arith.constant dense<0.000000e+00> : vector<16x64xf32>
    %3 = tpu.matmul %0, %1, %cst {dimension_numbers = #tpu.dot_dimension_numbers<[1], [0], [0], [1], [0, 0, 1, 1], [], []>} : vector<16x16xf32>, vector<16x64xf32>, vector<16x64xf32> -> vector<16x64xf32>
    %4 = vector.broadcast %2 : vector<1x64xf32> to vector<16x64xf32>
    %5 = arith.addf %3, %4 : vector<16x64xf32>
    %cst_5 = arith.constant 0.000000e+00 : f32
    %6 = vector.broadcast %cst_5 : f32 to vector<16x64xf32>
    %7 = arith.maximumf %5, %6 : vector<16x64xf32>
    %c0_6 = arith.constant 0 : index
    %c0_7 = arith.constant 0 : index
    %8 = vector.load %arg4[%c0_6, %c0_7] : memref<64x32xf32, #tpu.memory_space<vmem>>, vector<64x32xf32>
    %c0_8 = arith.constant 0 : index
    %c0_9 = arith.constant 0 : index
    %9 = vector.load %arg5[%c0_8, %c0_9] : memref<1x32xf32, #tpu.memory_space<vmem>>, vector<1x32xf32>
    %cst_10 = arith.constant dense<0.000000e+00> : vector<16x32xf32>
    %10 = tpu.matmul %7, %8, %cst_10 {dimension_numbers = #tpu.dot_dimension_numbers<[1], [0], [0], [1], [0, 0, 1, 1], [], []>} : vector<16x64xf32>, vector<64x32xf32>, vector<16x32xf32> -> vector<16x32xf32>
    %11 = vector.broadcast %9 : vector<1x32xf32> to vector<16x32xf32>
    %12 = arith.addf %10, %11 : vector<16x32xf32>
    %cst_11 = arith.constant 0.000000e+00 : f32
    %13 = vector.broadcast %cst_11 : f32 to vector<16x32xf32>
    %14 = arith.maximumf %12, %13 : vector<16x32xf32>
    %c0_12 = arith.constant 0 : index
    %c0_13 = arith.constant 0 : index
    %15 = vector.load %arg6[%c0_12, %c0_13] : memref<32x128xf32, #tpu.memory_space<vmem>>, vector<32x128xf32>
    %c0_14 = arith.constant 0 : index
    %c0_15 = arith.constant 0 : index
    %16 = vector.load %arg7[%c0_14, %c0_15] : memref<1x128xf32, #tpu.memory_space<vmem>>, vector<1x128xf32>
    %cst_16 = arith.constant dense<0.000000e+00> : vector<16x128xf32>
    %17 = tpu.matmul %14, %15, %cst_16 {dimension_numbers = #tpu.dot_dimension_numbers<[1], [0], [0], [1], [0, 0, 1, 1], [], []>} : vector<16x32xf32>, vector<32x128xf32>, vector<16x128xf32> -> vector<16x128xf32>
    %18 = vector.broadcast %16 : vector<1x128xf32> to vector<16x128xf32>
    %19 = arith.addf %17, %18 : vector<16x128xf32>
    %c0_17 = arith.constant 0 : index
    %c0_18 = arith.constant 0 : index
    %20 = vector.load %arg8[%c0_17, %c0_18] : memref<16x128xf32, #tpu.memory_space<vmem>>, vector<16x128xf32>
    tpu.vector_store %arg8[%c0_17, %c0_18], %19 {strides = array<i32>} : memref<16x128xf32, #tpu.memory_space<vmem>>, vector<16x128xf32>,
    return
  }
  func.func @transform_0(%arg0: i32) -> (i32, i32) {
    %c0_i32 = arith.constant 0 : i32
    %c0_i32_0 = arith.constant 0 : i32
    return %arg0, %c0_i32 : i32, i32
  }
  func.func @transform_1(%arg0: i32) -> (i32, i32) {
    %c0_i32 = arith.constant 0 : i32
    %c0_i32_0 = arith.constant 0 : i32
    %c0_i32_1 = arith.constant 0 : i32
    return %c0_i32, %c0_i32_0 : i32, i32
  }
  func.func @transform_2(%arg0: i32) -> (i32, i32) {
    %c0_i32 = arith.constant 0 : i32
    %c0_i32_0 = arith.constant 0 : i32
    %c0_i32_1 = arith.constant 0 : i32
    return %c0_i32, %c0_i32_0 : i32, i32
  }
  func.func @transform_3(%arg0: i32) -> (i32, i32) {
    %c0_i32 = arith.constant 0 : i32
    %c0_i32_0 = arith.constant 0 : i32
    %c0_i32_1 = arith.constant 0 : i32
    return %c0_i32, %c0_i32_0 : i32, i32
  }
  func.func @transform_4(%arg0: i32) -> (i32, i32) {
    %c0_i32 = arith.constant 0 : i32
    %c0_i32_0 = arith.constant 0 : i32
    %c0_i32_1 = arith.constant 0 : i32
    return %c0_i32, %c0_i32_0 : i32, i32
  }
  func.func @transform_5(%arg0: i32) -> (i32, i32) {
    %c0_i32 = arith.constant 0 : i32
    %c0_i32_0 = arith.constant 0 : i32
    %c0_i32_1 = arith.constant 0 : i32
    return %c0_i32, %c0_i32_0 : i32, i32
  }
  func.func @transform_6(%arg0: i32) -> (i32, i32) {
    %c0_i32 = arith.constant 0 : i32
    %c0_i32_0 = arith.constant 0 : i32
    %c0_i32_1 = arith.constant 0 : i32
    return %c0_i32, %c0_i32_0 : i32, i32
  }
  func.func @transform_7(%arg0: i32) -> (i32, i32) {
    %c0_i32 = arith.constant 0 : i32
    %c0_i32_0 = arith.constant 0 : i32
    return %arg0, %c0_i32 : i32, i32
  }
}

module attributes {stable_mosaic.version = 11 : i64} {
  func.func @kernel(%arg0: i32, %arg1: memref<16x16xf32, #tpu.memory_space<vmem>>, %arg2: memref<16x64xf32, #tpu.memory_space<vmem>>, %arg3: memref<1x64xf32, #tpu.memory_space<vmem>>, %arg4: memref<64x32xf32, #tpu.memory_space<vmem>>, %arg5: memref<1x32xf32, #tpu.memory_space<vmem>>, %arg6: memref<32x128xf32, #tpu.memory_space<vmem>>, %arg7: memref<1x128xf32, #tpu.memory_space<vmem>>, %arg8: memref<16x128xf32, #tpu.memory_space<vmem>>) attributes {dimension_semantics = [#tpu.dimension_semantics<parallel>], iteration_bounds = array<i64: 2>, scalar_prefetch = 0 : i64, scratch_operands = 0 : i64, tpu.core_type = #tpu.core_type<tc>, window_params = [{transform_indices = @transform_0, window_bounds = array<i64: 16, 16>}, {pipeline_mode = #tpu.pipeline_mode<synchronous>, transform_indices = @transform_1, window_bounds = array<i64: 16, 64>}, {pipeline_mode = #tpu.pipeline_mode<synchronous>, transform_indices = @transform_2, window_bounds = array<i64: 1, 64>}, {pipeline_mode = #tpu.pipeline_mode<synchronous>, transform_indices = @transform_3, window_bounds = array<i64: 64, 32>}, {pipeline_mode = #tpu.pipeline_mode<synchronous>, transform_indices = @transform_4, window_bounds = array<i64: 1, 32>}, {pipeline_mode = #tpu.pipeline_mode<synchronous>, transform_indices = @transform_5, window_bounds = array<i64: 32, 128>}, {pipeline_mode = #tpu.pipeline_mode<synchronous>, transform_indices = @transform_6, window_bounds = array<i64: 1, 128>}, {transform_indices = @transform_7, window_bounds = array<i64: 16, 128>}]} {
    %c0 = arith.constant 0 : index
    %c0_0 = arith.constant 0 : index
    %0 = vector.load %arg1[%c0, %c0_0] : memref<16x16xf32, #tpu.memory_space<vmem>>, vector<16x16xf32>
    %c0_1 = arith.constant 0 : index
    %c0_2 = arith.constant 0 : index
    %1 = vector.load %arg2[%c0_1, %c0_2] : memref<16x64xf32, #tpu.memory_space<vmem>>, vector<16x64xf32>
    %c0_3 = arith.constant 0 : index
    %c0_4 = arith.constant 0 : index
    %2 = vector.load %arg3[%c0_3, %c0_4] : memref<1x64xf32, #tpu.memory_space<vmem>>, vector<1x64xf32>
    %cst = arith.constant dense<0.000000e+00> : vector<16x64xf32>
    %3 = tpu.matmul %0, %1, %cst {dimension_numbers = #tpu.dot_dimension_numbers<[1], [0], [0], [1], [0, 0, 1, 1], [], []>} : vector<16x16xf32>, vector<16x64xf32>, vector<16x64xf32> -> vector<16x64xf32>
    %4 = vector.broadcast %2 : vector<1x64xf32> to vector<16x64xf32>
    %5 = arith.addf %3, %4 : vector<16x64xf32>
    %cst_5 = arith.constant 0.000000e+00 : f32
    %6 = vector.broadcast %cst_5 : f32 to vector<16x64xf32>
    %7 = arith.maximumf %5, %6 : vector<16x64xf32>
    %c0_6 = arith.constant 0 : index
    %c0_7 = arith.constant 0 : index
    %8 = vector.load %arg4[%c0_6, %c0_7] : memref<64x32xf32, #tpu.memory_space<vmem>>, vector<64x32xf32>
    %c0_8 = arith.constant 0 : index
    %c0_9 = arith.constant 0 : index
    %9 = vector.load %arg5[%c0_8, %c0_9] : memref<1x32xf32, #tpu.memory_space<vmem>>, vector<1x32xf32>
    %cst_10 = arith.constant dense<0.000000e+00> : vector<16x32xf32>
    %10 = tpu.matmul %7, %8, %cst_10 {dimension_numbers = #tpu.dot_dimension_numbers<[1], [0], [0], [1], [0, 0, 1, 1], [], []>} : vector<16x64xf32>, vector<64x32xf32>, vector<16x32xf32> -> vector<16x32xf32>
    %11 = vector.broadcast %9 : vector<1x32xf32> to vector<16x32xf32>
    %12 = arith.addf %10, %11 : vector<16x32xf32>
    %cst_11 = arith.constant 0.000000e+00 : f32
    %13 = vector.broadcast %cst_11 : f32 to vector<16x32xf32>
    %14 = arith.maximumf %12, %13 : vector<16x32xf32>
    %c0_12 = arith.constant 0 : index
    %c0_13 = arith.constant 0 : index
    %15 = vector.load %arg6[%c0_12, %c0_13] : memref<32x128xf32, #tpu.memory_space<vmem>>, vector<32x128xf32>
    %c0_14 = arith.constant 0 : index
    %c0_15 = arith.constant 0 : index
    %16 = vector.load %arg7[%c0_14, %c0_15] : memref<1x128xf32, #tpu.memory_space<vmem>>, vector<1x128xf32>
    %cst_16 = arith.constant dense<0.000000e+00> : vector<16x128xf32>
    %17 = tpu.matmul %14, %15, %cst_16 {dimension_numbers = #tpu.dot_dimension_numbers<[1], [0], [0], [1], [0, 0, 1, 1], [], []>} : vector<16x32xf32>, vector<32x128xf32>, vector<16x128xf32> -> vector<16x128xf32>
    %18 = vector.broadcast %16 : vector<1x128xf32> to vector<16x128xf32>
    %19 = arith.addf %17, %18 : vector<16x128xf32>
    %c0_17 = arith.constant 0 : index
    %c0_18 = arith.constant 0 : index
    %20 = vector.load %arg8[%c0_17, %c0_18] : memref<16x128xf32, #tpu.memory_space<vmem>>, vector<16x128xf32>
    tpu.vector_store %arg8[%c0_17, %c0_18], %19 {strides = array<i32>} : memref<16x128xf32, #tpu.memory_space<vmem>>, vector<16x128xf32>,
    return
  }
  func.func @transform_0(%arg0: i32) -> (i32, i32) {
    %c0_i32 = arith.constant 0 : i32
    %c0_i32_0 = arith.constant 0 : i32
    return %arg0, %c0_i32 : i32, i32
  }
  func.func @transform_1(%arg0: i32) -> (i32, i32) {
    %c0_i32 = arith.constant 0 : i32
    %c0_i32_0 = arith.constant 0 : i32
    %c0_i32_1 = arith.constant 0 : i32
    return %c0_i32, %c0_i32_0 : i32, i32
  }
  func.func @transform_2(%arg0: i32) -> (i32, i32) {
    %c0_i32 = arith.constant 0 : i32
    %c0_i32_0 = arith.constant 0 : i32
    %c0_i32_1 = arith.constant 0 : i32
    return %c0_i32, %c0_i32_0 : i32, i32
  }
  func.func @transform_3(%arg0: i32) -> (i32, i32) {
    %c0_i32 = arith.constant 0 : i32
    %c0_i32_0 = arith.constant 0 : i32
    %c0_i32_1 = arith.constant 0 : i32
    return %c0_i32, %c0_i32_0 : i32, i32
  }
  func.func @transform_4(%arg0: i32) -> (i32, i32) {
    %c0_i32 = arith.constant 0 : i32
    %c0_i32_0 = arith.constant 0 : i32
    %c0_i32_1 = arith.constant 0 : i32
    return %c0_i32, %c0_i32_0 : i32, i32
  }
  func.func @transform_5(%arg0: i32) -> (i32, i32) {
    %c0_i32 = arith.constant 0 : i32
    %c0_i32_0 = arith.constant 0 : i32
    %c0_i32_1 = arith.constant 0 : i32
    return %c0_i32, %c0_i32_0 : i32, i32
  }
  func.func @transform_6(%arg0: i32) -> (i32, i32) {
    %c0_i32 = arith.constant 0 : i32
    %c0_i32_0 = arith.constant 0 : i32
    %c0_i32_1 = arith.constant 0 : i32
    return %c0_i32, %c0_i32_0 : i32, i32
  }
  func.func @transform_7(%arg0: i32) -> (i32, i32) {
    %c0_i32 = arith.constant 0 : i32
    %c0_i32_0 = arith.constant 0 : i32
    return %arg0, %c0_i32 : i32, i32
  }
}

</mosaic_0001>

<bundles_post_ra>
// kernel: tpu_custom_call.1
= control target key start
LH: loop header
LB: loop body
LE: loop exit
PB: predicated region body
PF: predicated region fallthrough
CT: control target
= control target key end

     0   :  { %12 = vsyncpa [#allocation3], 0  ;;  %s1053_s0 = inlined_call_operand.vmem [shape: f32[32,16], index: 0, kind: input, shape index: {}]   ;;  %s1054_s1 = inlined_call_operand.vmem [shape: f32[16,64], index: 1, kind: input, shape index: {}]   ;;  %s1055_s2 = inlined_call_operand.vmem [shape: f32[1,64], index: 2, kind: input, shape index: {}]   ;;  %s1056_s3 = inlined_call_operand.vmem [shape: f32[64,32], index: 3, kind: input, shape index: {}]   ;;  %s1057_s4 = inlined_call_operand.vmem [shape: f32[1,32], index: 4, kind: input, shape index: {}]   ;;  %s1058_s5 = inlined_call_operand.vmem [shape: f32[32,128], index: 5, kind: input, shape index: {}]   ;;  %s1059_s6 = inlined_call_operand.vmem [shape: f32[1,128], index: 6, kind: input, shape index: {}]   ;;  %s1060_s7 = inlined_call_operand.hbm [shape: f32[32,128], index: 7, kind: output, shape index: {}]  }
   0x1   :  { %14 = vsyncpa [#allocation3 + $0x1], 0  ;;  %s900_s24 = smov 0   ;;  %s902_s25 = smov 0  }
   0x2   :  { %s904_s26 = smov 0   ;;  %s906_s27 = smov 0  }
   0x3 LB: > { %s921_s28 = sadd.s32 4294967295, %s855_s27   ;;  %s645_s29 = sadd.s32 4294967294, %s855_s27   ;;  %s855_s27 = sphi %s906_s27, %s1066_s27   ;;  %s851_s26 = sphi %s904_s26, %s1065_s26   ;;  %s847_s25 = sphi %s902_s25, %s1064_s25   ;;  %s843_s24 = sphi %s900_s24, %s1063_s24  }
   0x4   : > { %s925_s30 = sadd.s32 1, %s855_s27   ;;  %s179_s8 = sadd.s32 1, %s851_s26 }
   0x5   : > { %s176_s9 = ssub.s32 %s855_s27, %s925_s30  ;;  %p189_p0 = scmp.ne.s32.totalorder %s851_s26, %s847_s25 }
   0x6   : > { %p177_p1 = scmp.eq.s32.totalorder %s176_s9, 0  ;;  %p190_p2 = scmp.eq.s32.totalorder %s921_s28, 1 }
   0x7   : > { %p195_p3 = scmp.ne.s32.totalorder %s847_s25, %s843_s24  ;;  %p196_p4 = scmp.eq.s32.totalorder %s645_s29, 1 }
   0x8   : > { %s936_s10 = scalar_select %p177_p1, %s851_s26, %s179_s8  }
   0x9   : > { %p938_p5 = por %p190_p2, %p189_p0  ;;  %p942_p6 = por %p196_p4, %p195_p3 }
   0xa   : > { %p648_p7 = scmp.ge.s32.totalorder %s855_s27, 1  ;;  %p241_p8 = scmp.lt.s32.totalorder %s855_s27, 3 }
   0xc   : > { %p242_p9 = pnand %p648_p7, %p241_p8 }
   0xd   : > { %v282_v0 = vld [vmem:[%s1054_s1] sm:$0xff] (!%p242_p9)  ;;  %v283_v1 = vld [vmem:[%s1054_s1 + $0x8] sm:$0xff] (!%p242_p9)  ;;  %s650_s17 = sshll.u32 (!%p242_p9), %s921_s28, 1  ;;  %v377_v5 = vld [vmem:[%s1056_s3 + $0x10] sm:$0xff] (!%p242_p9)  ;;  %vm291_vm0 = vcmask (!%p242_p9), 130048   ;;  %vm390_vm1 = vcmask (!%p242_p9), 523264  }
   0xe   : > { %245 = sbr.rel (%p242_p9) target bundleno = 692 (0x2b4), region = 48  ;;  %v375_v2 = vld [vmem:[%s1056_s3] sm:$0xff] (!%p242_p9)  ;;  %v724_v3 = vpack.c.bf16 (!%p242_p9), %v283_v1, %v282_v0  ;;  %p274_p10 = scmp.lt.s32.totalorder (!%p242_p9), %s650_s17, 3  ;;  %v376_v4 = vld [vmem:[%s1056_s3 + $0x8] sm:$0xff] (!%p242_p9)  ;;  %v378_v6 = vld [vmem:[%s1056_s3 + $0x18] sm:$0xff] (!%p242_p9)  ;;  %vm485_vm2 = vcmask (!%p242_p9), 261120  }
   0xf   : > { %v728_v7 = vpack.c.bf16 (!%p242_p9), %v376_v4, %v375_v2  ;;  %v732_v8 = vpack.c.bf16 (!%p242_p9), %v378_v6, %v377_v5  ;;  %v379_v9 = vld [vmem:[%s1056_s3 + $0x20] sm:$0xff] (!%p242_p9)  ;;  %v380_v10 = vld [vmem:[%s1056_s3 + $0x28] sm:$0xff] (!%p242_p9)  ;;  %v381_v14 = vld [vmem:[%s1056_s3 + $0x30] sm:$0xff] (!%p242_p9)  ;;  %s666_s14 = sshll.u32 (!%p242_p9), %s921_s28, 8  ;;  %s857_s28 = smov (!%p242_p9), [#allocation2]  }
  0x10   : > { %725 = vmatprep.subr.bf16.mxu0 (!%p242_p9), %v724_v3  ;;  %v736_v11 = vpack.c.bf16 (!%p242_p9), %v380_v10, %v379_v9  ;;  %v382_v15 = vld [vmem:[%s1056_s3 + $0x38] sm:$0xff] (!%p242_p9)  ;;  %v474_v17 = vld [vmem:[%s1058_s5] sm:$0xff] (!%p242_p9)  ;;  %v475_v18 = vld [vmem:[%s1058_s5 + $0x8] sm:$0xff] (!%p242_p9)  ;;  %s1010_s18 = scalar_lea.hbm (!%p242_p9), %s1060_s7, %s666_s14  ;;  %s797_s21 = sshll.u32 (!%p242_p9), %s857_s28, 4  ;;  %s798_s21 = int_to_ptr.vmem [resolvable:$false] %s797_s21 }
  0x11   : > { %727 = vmatpush3.bf16.msra.mxu0 (!%p242_p9), %v724_v3  ;;  %729 = vmatprep.subr.bf16.mxu1 (!%p242_p9), %v728_v7  ;;  %v740_v16 = vpack.c.bf16 (!%p242_p9), %v382_v15, %v381_v14  ;;  %v744_v19 = vpack.c.bf16 (!%p242_p9), %v475_v18, %v474_v17  ;;  %v652_v20 = vld [vmem:[%s1055_s2] ss:$0 sm:$0xff] (!%p242_p9)  ;;  %v476_v27 = vld [vmem:[%s1058_s5 + $0x10] sm:$0xff] (!%p242_p9)  ;;  %v477_v28 = vld [vmem:[%s1058_s5 + $0x18] sm:$0xff] (!%p242_p9)  ;;  %s799_s22 = scalar_lea.vmem (!%p242_p9), %s798_s21, 512 }
  0x12   : > { %731 = vmatpush3.bf16.msra.mxu1 (!%p242_p9), %v728_v7  ;;  %v748_v29 = vpack.c.bf16 (!%p242_p9), %v477_v28, %v476_v27  ;;  %v655_v30 = vld [vmem:[%s1057_s4] ss:$0 sm:$0xff] (!%p242_p9) }
  0x13   : > { %733 = vmatprep.subr.bf16.mxu1 (!%p242_p9), %v732_v8  ;;  %745 = vmatprep.subr.bf16.mxu0 (!%p242_p9), %v744_v19  ;;  %v658_v37 = vld [vmem:[%s1059_s6] ss:$0 sm:$0xff] (!%p242_p9) }
  0x15   : > { %s1068_s17 = smov (!%p274_p10, %s650_s17), 3 }
  0x16   : > { %s651_s16 = sshll.u32 %s1068_s17, 3  ;;  %735 = vmatpush3.bf16.msra.mxu1 %v732_v8  ;;  %s270_s17 = sand.u32 1, %s847_s25  }
  0x17   : > { %s277_s20 = scalar_lea.vmem %s1053_s0, %s651_s16  ;;  %737 = vmatprep.subr.bf16.mxu1 %v736_v11  ;;  %s649_s23 = sshll.u32 %s270_s17, 4 }
  0x18   : > { %v280_v12 = vld [vmem:[%s277_s20] sm:$0xff]  ;;  %v281_v13 = vld [vmem:[%s277_s20 + $0x8] sm:$0xff]  ;;  %s272_s9 = scalar_lea.vmem [#allocation2], %s649_s23  ;;  %s1012_s19 = scalar_lea.sflag [#allocation3], %s270_s17 }
  0x19   : > { %691 = vmatprep.mubr.msk.f32.mxu0 %vm291_vm0, %v280_v12  ;;  %s583_s13 = sshll.u32 %s272_s9, 4  ;;  %s1005_s13 = int_to_ptr.vmem [resolvable:$true] %s583_s13 }
  0x1a   : > { %692 = vmatmul.mubr.msk.f32.vlgmr.msra.gmra.mrb[0].mxu0 %vm291_vm0, %v281_v13  ;;  %739 = vmatpush3.bf16.msra.mxu1 %v736_v11  ;;  %s793_s20 = scalar_lea.vmem %s1005_s13, 256  ;;  %p800_p0 = scmp.lt.s32.totalorder %s1005_s13, %s798_s21 }
  0x1b   : > { %741 = vmatprep.subr.bf16.mxu1 %v740_v16  ;;  %747 = vmatpush3.bf16.msra.mxu0 %v744_v19  ;;  %p794_p11 = scmp.ne.s32.totalorder %s1005_s13, %s793_s20  ;;  %p801_p1 = scmp.lt.s32.totalorder %s799_s22, %s793_s20 }
  0x1c   : > { %749 = vmatprep.subr.bf16.mxu0 %v748_v29 }
  0x1d   : > { %p795_p12 = pnand %p794_p11, %p938_p5  ;;  %p802_p2 = por %p801_p1, %p800_p0 }
  0x1e   : > { %743 = vmatpush3.bf16.msra.mxu1 %v740_v16 }
  0x1f   : > { %751 = vmatpush3.bf16.msra.mxu0 %v748_v29  ;;  %p796_p13 = pneg %p795_p12 }
  0x21   : > { %p803_p3 = pnand %p802_p2, %p796_p13 }
  0xed   : > { %v693_v21 = vpop.f32.mrb[0].mxu0 }
  0xee   : > { %v370_v22 = vadd.f32 %v693_v21, %v652_v20  ;;  %v364_v23 = vpop.f32.mrb[1].mxu0 }
  0xef   : > { %v365_v24 = vadd.f32 %v652_v20, %v364_v23 }
  0xf0   : > { %v374_v26 = vmax.f32 %v370_v22, 0.0 }
  0xf1   : > { %v373_v25 = vmax.f32 %v365_v24, 0.0 }
  0xf3   : > { %710 = vmatprep.mubr.msk.f32.mxu1 %vm390_vm1, %v373_v25 }
  0xf4   : > { %711 = vmatmul.mubr.msk.f32.vlgmr.msra.gmra.mrb[0].mxu1 %vm390_vm1, %v374_v26 }
 0x1c7   : > { %v712_v31 = vpop.f32.mrb[0].mxu1 }
 0x1c8   : > { %v469_v32 = vadd.f32 %v712_v31, %v655_v30  ;;  %v463_v33 = vpop.f32.mrb[1].mxu1 }
 0x1c9   : > { %v464_v34 = vadd.f32 %v655_v30, %v463_v33 }
 0x1ca   : > { %v473_v36 = vmax.f32 %v469_v32, 0.0 }
 0x1cb   : > { %v472_v35 = vmax.f32 %v464_v34, 0.0 }
 0x1cd   : > { %721 = vmatprep.mubr.msk.f32.mxu0 %vm485_vm2, %v472_v35 }
 0x1ce   : > { %722 = vmatmul.mubr.msk.f32.vlgmr.msra.gmra.mrb[2].mxu0 %vm485_vm2, %v473_v36 }
 0x2a1   : > { %v723_v38 = vpop.f32.mrb[2].mxu0 }
 0x2a2   : > { %v564_v39 = vadd.f32 %v723_v38, %v658_v37  ;;  %v558_v40 = vpop.f32.mrb[3].mxu0 }
 0x2a3   : > { %v559_v41 = vadd.f32 %v658_v37, %v558_v40 }
 0x2a4   : > { %568 = vst [vmem:[%s272_s9 + $0x8] sm:$0xff] %v564_v39 }
 0x2a5   : > { %567 = vst [vmem:[%s272_s9] sm:$0xff] %v559_v41 }
 0x2a6   : > { %806 = shalt.err (!%p803_p3)
}
 0x2a7   : > { %s807_s17 = scalar_lea.hbm %s1010_s18, 256  ;;  %s811_s8 = scalar_lea.hbm %s1060_s7, 512 }
 0x2a8   : > { %p808_p4 = scmp.ne.s32.totalorder %s1010_s18, %s807_s17  ;;  %p812_p9 = scmp.lt.u32.totalorder %s1010_s18, %s1060_s7 }
 0x2a9   : > { %p813_p10 = scmp.lt.u32.totalorder %s811_s8, %s807_s17  ;;  %p815_p12 = scmp.lt.u32.totalorder %s807_s17, %s1010_s18 }
 0x2aa   : > { %p809_p7 = pnand %p808_p4, %p938_p5 }
 0x2ab   : > { %p814_p11 = por %p813_p10, %p812_p9 }
 0x2ac   : > { %p810_p8 = pneg %p809_p7 }
 0x2ad   : > { %p816_p13 = por %p815_p12, %p814_p11 }
 0x2af   : > { %p817_p0 = pnand %p816_p13, %p810_p8 }
 0x2b1   : > { %820 = shalt.err (!%p817_p0)
}
 0x2b2   : > { %s858_s15 = smov 128   ;;  %s859_s16 = smov 8  }
 0x2b3   : > { %752 = dma.vmem_to_hbm [thread:$0]  (%p938_p5), %s1005_s13, 256, %s1010_s18, %s1012_s19, %s858_s15, %s858_s15, %s859_s16  }
 0x2b4 PF: > { %p758_p1 = scmp.ge.s32.totalorder %s855_s27, 2  ;;  %s598_s20 = sand.u32 1, %s843_s24  }
 0x2b5   : > { %s599_s28 = scalar_lea.sflag [#allocation3], %s598_s20 }
 0x2b6   : > { %p755_p2 = pnand %p758_p1, %p942_p6 }
 0x2b8   : > { %838 = dma.done.wait (!%p755_p2), %s599_s28, 256  }
 0x2b9   : > { %840 = vsyncadd (!%p755_p2), %s599_s28, 4294967040  ;;  %p17_p3 = scmp.ge.s32.totalorder %s925_s30, 4   ;;  %s1063_s24 = smov %s847_s25 }
 0x2ba   : > { %s1064_s25 = smov %s851_s26  ;;  %s1065_s26 = smov %s936_s10 }
 0x2bb   : > { %s1066_s27 = smov %s925_s30  ;;  %19 = sbr.rel (!%p17_p3) target bundleno = 3 (0x3), region = 83 }
 0x2c2   :  { %604 = vsyncpa [#allocation3], 1 }
 0x2c3   :  { %606 = vsyncpa [#allocation3 + $0x1], 1 }

// kernel: tpu_custom_call.1
= control target key start
LH: loop header
LB: loop body
LE: loop exit
PB: predicated region body
PF: predicated region fallthrough
CT: control target
= control target key end

     0   :  { %12 = vsyncpa [#allocation3], 0  ;;  %s1053_s0 = inlined_call_operand.vmem [shape: f32[32,16], index: 0, kind: input, shape index: {}]   ;;  %s1054_s1 = inlined_call_operand.vmem [shape: f32[16,64], index: 1, kind: input, shape index: {}]   ;;  %s1055_s2 = inlined_call_operand.vmem [shape: f32[1,64], index: 2, kind: input, shape index: {}]   ;;  %s1056_s3 = inlined_call_operand.vmem [shape: f32[64,32], index: 3, kind: input, shape index: {}]   ;;  %s1057_s4 = inlined_call_operand.vmem [shape: f32[1,32], index: 4, kind: input, shape index: {}]   ;;  %s1058_s5 = inlined_call_operand.vmem [shape: f32[32,128], index: 5, kind: input, shape index: {}]   ;;  %s1059_s6 = inlined_call_operand.vmem [shape: f32[1,128], index: 6, kind: input, shape index: {}]   ;;  %s1060_s7 = inlined_call_operand.hbm [shape: f32[32,128], index: 7, kind: output, shape index: {}]  }
   0x1   :  { %14 = vsyncpa [#allocation3 + $0x1], 0  ;;  %s900_s24 = smov 0   ;;  %s902_s25 = smov 0  }
   0x2   :  { %s904_s26 = smov 0   ;;  %s906_s27 = smov 0  }
   0x3 LB: > { %s921_s28 = sadd.s32 4294967295, %s855_s27   ;;  %s645_s29 = sadd.s32 4294967294, %s855_s27   ;;  %s855_s27 = sphi %s906_s27, %s1066_s27   ;;  %s851_s26 = sphi %s904_s26, %s1065_s26   ;;  %s847_s25 = sphi %s902_s25, %s1064_s25   ;;  %s843_s24 = sphi %s900_s24, %s1063_s24  }
   0x4   : > { %s925_s30 = sadd.s32 1, %s855_s27   ;;  %s179_s8 = sadd.s32 1, %s851_s26 }
   0x5   : > { %s176_s9 = ssub.s32 %s855_s27, %s925_s30  ;;  %p189_p0 = scmp.ne.s32.totalorder %s851_s26, %s847_s25 }
   0x6   : > { %p177_p1 = scmp.eq.s32.totalorder %s176_s9, 0  ;;  %p190_p2 = scmp.eq.s32.totalorder %s921_s28, 1 }
   0x7   : > { %p195_p3 = scmp.ne.s32.totalorder %s847_s25, %s843_s24  ;;  %p196_p4 = scmp.eq.s32.totalorder %s645_s29, 1 }
   0x8   : > { %s936_s10 = scalar_select %p177_p1, %s851_s26, %s179_s8  }
   0x9   : > { %p938_p5 = por %p190_p2, %p189_p0  ;;  %p942_p6 = por %p196_p4, %p195_p3 }
   0xa   : > { %p648_p7 = scmp.ge.s32.totalorder %s855_s27, 1  ;;  %p241_p8 = scmp.lt.s32.totalorder %s855_s27, 3 }
   0xc   : > { %p242_p9 = pnand %p648_p7, %p241_p8 }
   0xd   : > { %v282_v0 = vld [vmem:[%s1054_s1] sm:$0xff] (!%p242_p9)  ;;  %v283_v1 = vld [vmem:[%s1054_s1 + $0x8] sm:$0xff] (!%p242_p9)  ;;  %s650_s17 = sshll.u32 (!%p242_p9), %s921_s28, 1  ;;  %v377_v5 = vld [vmem:[%s1056_s3 + $0x10] sm:$0xff] (!%p242_p9)  ;;  %vm291_vm0 = vcmask (!%p242_p9), 130048   ;;  %vm390_vm1 = vcmask (!%p242_p9), 523264  }
   0xe   : > { %245 = sbr.rel (%p242_p9) target bundleno = 692 (0x2b4), region = 48  ;;  %v375_v2 = vld [vmem:[%s1056_s3] sm:$0xff] (!%p242_p9)  ;;  %v724_v3 = vpack.c.bf16 (!%p242_p9), %v283_v1, %v282_v0  ;;  %p274_p10 = scmp.lt.s32.totalorder (!%p242_p9), %s650_s17, 3  ;;  %v376_v4 = vld [vmem:[%s1056_s3 + $0x8] sm:$0xff] (!%p242_p9)  ;;  %v378_v6 = vld [vmem:[%s1056_s3 + $0x18] sm:$0xff] (!%p242_p9)  ;;  %vm485_vm2 = vcmask (!%p242_p9), 261120  }
   0xf   : > { %v728_v7 = vpack.c.bf16 (!%p242_p9), %v376_v4, %v375_v2  ;;  %v732_v8 = vpack.c.bf16 (!%p242_p9), %v378_v6, %v377_v5  ;;  %v379_v9 = vld [vmem:[%s1056_s3 + $0x20] sm:$0xff] (!%p242_p9)  ;;  %v380_v10 = vld [vmem:[%s1056_s3 + $0x28] sm:$0xff] (!%p242_p9)  ;;  %v381_v14 = vld [vmem:[%s1056_s3 + $0x30] sm:$0xff] (!%p242_p9)  ;;  %s666_s14 = sshll.u32 (!%p242_p9), %s921_s28, 8  ;;  %s857_s28 = smov (!%p242_p9), [#allocation2]  }
  0x10   : > { %725 = vmatprep.subr.bf16.mxu0 (!%p242_p9), %v724_v3  ;;  %v736_v11 = vpack.c.bf16 (!%p242_p9), %v380_v10, %v379_v9  ;;  %v382_v15 = vld [vmem:[%s1056_s3 + $0x38] sm:$0xff] (!%p242_p9)  ;;  %v474_v17 = vld [vmem:[%s1058_s5] sm:$0xff] (!%p242_p9)  ;;  %v475_v18 = vld [vmem:[%s1058_s5 + $0x8] sm:$0xff] (!%p242_p9)  ;;  %s1010_s18 = scalar_lea.hbm (!%p242_p9), %s1060_s7, %s666_s14  ;;  %s797_s21 = sshll.u32 (!%p242_p9), %s857_s28, 4  ;;  %s798_s21 = int_to_ptr.vmem [resolvable:$false] %s797_s21 }
  0x11   : > { %727 = vmatpush3.bf16.msra.mxu0 (!%p242_p9), %v724_v3  ;;  %729 = vmatprep.subr.bf16.mxu1 (!%p242_p9), %v728_v7  ;;  %v740_v16 = vpack.c.bf16 (!%p242_p9), %v382_v15, %v381_v14  ;;  %v744_v19 = vpack.c.bf16 (!%p242_p9), %v475_v18, %v474_v17  ;;  %v652_v20 = vld [vmem:[%s1055_s2] ss:$0 sm:$0xff] (!%p242_p9)  ;;  %v476_v27 = vld [vmem:[%s1058_s5 + $0x10] sm:$0xff] (!%p242_p9)  ;;  %v477_v28 = vld [vmem:[%s1058_s5 + $0x18] sm:$0xff] (!%p242_p9)  ;;  %s799_s22 = scalar_lea.vmem (!%p242_p9), %s798_s21, 512 }
  0x12   : > { %731 = vmatpush3.bf16.msra.mxu1 (!%p242_p9), %v728_v7  ;;  %v748_v29 = vpack.c.bf16 (!%p242_p9), %v477_v28, %v476_v27  ;;  %v655_v30 = vld [vmem:[%s1057_s4] ss:$0 sm:$0xff] (!%p242_p9) }
  0x13   : > { %733 = vmatprep.subr.bf16.mxu1 (!%p242_p9), %v732_v8  ;;  %745 = vmatprep.subr.bf16.mxu0 (!%p242_p9), %v744_v19  ;;  %v658_v37 = vld [vmem:[%s1059_s6] ss:$0 sm:$0xff] (!%p242_p9) }
  0x15   : > { %s1068_s17 = smov (!%p274_p10, %s650_s17), 3 }
  0x16   : > { %s651_s16 = sshll.u32 %s1068_s17, 3  ;;  %735 = vmatpush3.bf16.msra.mxu1 %v732_v8  ;;  %s270_s17 = sand.u32 1, %s847_s25  }
  0x17   : > { %s277_s20 = scalar_lea.vmem %s1053_s0, %s651_s16  ;;  %737 = vmatprep.subr.bf16.mxu1 %v736_v11  ;;  %s649_s23 = sshll.u32 %s270_s17, 4 }
  0x18   : > { %v280_v12 = vld [vmem:[%s277_s20] sm:$0xff]  ;;  %v281_v13 = vld [vmem:[%s277_s20 + $0x8] sm:$0xff]  ;;  %s272_s9 = scalar_lea.vmem [#allocation2], %s649_s23  ;;  %s1012_s19 = scalar_lea.sflag [#allocation3], %s270_s17 }
  0x19   : > { %691 = vmatprep.mubr.msk.f32.mxu0 %vm291_vm0, %v280_v12  ;;  %s583_s13 = sshll.u32 %s272_s9, 4  ;;  %s1005_s13 = int_to_ptr.vmem [resolvable:$true] %s583_s13 }
  0x1a   : > { %692 = vmatmul.mubr.msk.f32.vlgmr.msra.gmra.mrb[0].mxu0 %vm291_vm0, %v281_v13  ;;  %739 = vmatpush3.bf16.msra.mxu1 %v736_v11  ;;  %s793_s20 = scalar_lea.vmem %s1005_s13, 256  ;;  %p800_p0 = scmp.lt.s32.totalorder %s1005_s13, %s798_s21 }
  0x1b   : > { %741 = vmatprep.subr.bf16.mxu1 %v740_v16  ;;  %747 = vmatpush3.bf16.msra.mxu0 %v744_v19  ;;  %p794_p11 = scmp.ne.s32.totalorder %s1005_s13, %s793_s20  ;;  %p801_p1 = scmp.lt.s32.totalorder %s799_s22, %s793_s20 }
  0x1c   : > { %749 = vmatprep.subr.bf16.mxu0 %v748_v29 }
  0x1d   : > { %p795_p12 = pnand %p794_p11, %p938_p5  ;;  %p802_p2 = por %p801_p1, %p800_p0 }
  0x1e   : > { %743 = vmatpush3.bf16.msra.mxu1 %v740_v16 }
  0x1f   : > { %751 = vmatpush3.bf16.msra.mxu0 %v748_v29  ;;  %p796_p13 = pneg %p795_p12 }
  0x21   : > { %p803_p3 = pnand %p802_p2, %p796_p13 }
  0xed   : > { %v693_v21 = vpop.f32.mrb[0].mxu0 }
  0xee   : > { %v370_v22 = vadd.f32 %v693_v21, %v652_v20  ;;  %v364_v23 = vpop.f32.mrb[1].mxu0 }
  0xef   : > { %v365_v24 = vadd.f32 %v652_v20, %v364_v23 }
  0xf0   : > { %v374_v26 = vmax.f32 %v370_v22, 0.0 }
  0xf1   : > { %v373_v25 = vmax.f32 %v365_v24, 0.0 }
  0xf3   : > { %710 = vmatprep.mubr.msk.f32.mxu1 %vm390_vm1, %v373_v25 }
  0xf4   : > { %711 = vmatmul.mubr.msk.f32.vlgmr.msra.gmra.mrb[0].mxu1 %vm390_vm1, %v374_v26 }
 0x1c7   : > { %v712_v31 = vpop.f32.mrb[0].mxu1 }
 0x1c8   : > { %v469_v32 = vadd.f32 %v712_v31, %v655_v30  ;;  %v463_v33 = vpop.f32.mrb[1].mxu1 }
 0x1c9   : > { %v464_v34 = vadd.f32 %v655_v30, %v463_v33 }
 0x1ca   : > { %v473_v36 = vmax.f32 %v469_v32, 0.0 }
 0x1cb   : > { %v472_v35 = vmax.f32 %v464_v34, 0.0 }
 0x1cd   : > { %721 = vmatprep.mubr.msk.f32.mxu0 %vm485_vm2, %v472_v35 }
 0x1ce   : > { %722 = vmatmul.mubr.msk.f32.vlgmr.msra.gmra.mrb[2].mxu0 %vm485_vm2, %v473_v36 }
 0x2a1   : > { %v723_v38 = vpop.f32.mrb[2].mxu0 }
 0x2a2   : > { %v564_v39 = vadd.f32 %v723_v38, %v658_v37  ;;  %v558_v40 = vpop.f32.mrb[3].mxu0 }
 0x2a3   : > { %v559_v41 = vadd.f32 %v658_v37, %v558_v40 }
 0x2a4   : > { %568 = vst [vmem:[%s272_s9 + $0x8] sm:$0xff] %v564_v39 }
 0x2a5   : > { %567 = vst [vmem:[%s272_s9] sm:$0xff] %v559_v41 }
 0x2a6   : > { %806 = shalt.err (!%p803_p3)
}
 0x2a7   : > { %s807_s17 = scalar_lea.hbm %s1010_s18, 256  ;;  %s811_s8 = scalar_lea.hbm %s1060_s7, 512 }
 0x2a8   : > { %p808_p4 = scmp.ne.s32.totalorder %s1010_s18, %s807_s17  ;;  %p812_p9 = scmp.lt.u32.totalorder %s1010_s18, %s1060_s7 }
 0x2a9   : > { %p813_p10 = scmp.lt.u32.totalorder %s811_s8, %s807_s17  ;;  %p815_p12 = scmp.lt.u32.totalorder %s807_s17, %s1010_s18 }
 0x2aa   : > { %p809_p7 = pnand %p808_p4, %p938_p5 }
 0x2ab   : > { %p814_p11 = por %p813_p10, %p812_p9 }
 0x2ac   : > { %p810_p8 = pneg %p809_p7 }
 0x2ad   : > { %p816_p13 = por %p815_p12, %p814_p11 }
 0x2af   : > { %p817_p0 = pnand %p816_p13, %p810_p8 }
 0x2b1   : > { %820 = shalt.err (!%p817_p0)
}
 0x2b2   : > { %s858_s15 = smov 128   ;;  %s859_s16 = smov 8  }
 0x2b3   : > { %752 = dma.vmem_to_hbm [thread:$0]  (%p938_p5), %s1005_s13, 256, %s1010_s18, %s1012_s19, %s858_s15, %s858_s15, %s859_s16  }
 0x2b4 PF: > { %p758_p1 = scmp.ge.s32.totalorder %s855_s27, 2  ;;  %s598_s20 = sand.u32 1, %s843_s24  }
 0x2b5   : > { %s599_s28 = scalar_lea.sflag [#allocation3], %s598_s20 }
 0x2b6   : > { %p755_p2 = pnand %p758_p1, %p942_p6 }
 0x2b8   : > { %838 = dma.done.wait (!%p755_p2), %s599_s28, 256  }
 0x2b9   : > { %840 = vsyncadd (!%p755_p2), %s599_s28, 4294967040  ;;  %p17_p3 = scmp.ge.s32.totalorder %s925_s30, 4   ;;  %s1063_s24 = smov %s847_s25 }
 0x2ba   : > { %s1064_s25 = smov %s851_s26  ;;  %s1065_s26 = smov %s936_s10 }
 0x2bb   : > { %s1066_s27 = smov %s925_s30  ;;  %19 = sbr.rel (!%p17_p3) target bundleno = 3 (0x3), region = 83 }
 0x2c2   :  { %604 = vsyncpa [#allocation3], 1 }
 0x2c3   :  { %606 = vsyncpa [#allocation3 + $0x1], 1 }

</bundles_post_ra>
